<compile_context>
chip_gen: v7x
topology: tpu7x:2x2x1
jax: 0.10.0
libtpu: 0.0.40
codegen_flags: <defaults>
</compile_context>

<pallas_src>
import jax
import jax.numpy as jnp
from jax.experimental import pallas as pl
from jax.experimental.pallas import tpu as pltpu


def _cdiv(a, b):
    return -(-a // b)


def _fma_kernel(w_ref, b_ref, x_ref, o_ref):
    # w_ref, b_ref live in SMEM as scalars; x_ref / o_ref are lane-dense VMEM
    # tiles. Compute in f32, cast back to the output dtype.
    w = w_ref[0]
    b = b_ref[0]
    o_ref[...] = (x_ref[...].astype(jnp.float32) * w + b).astype(o_ref.dtype)


def linear_forward(x, weight, bias, *, block_rows=1024, lanes=512,
                   pallas_min_elems=1024):
    """y = x @ weight.T + bias  with weight [1,1], bias [1], x [N,1]."""
    n, in_f = x.shape
    assert in_f == 1 and weight.shape == (1, 1) and bias.shape == (1,)
    assert block_rows % 8 == 0 and lanes % 128 == 0
    w = weight.reshape((1,)).astype(jnp.float32)
    b = bias.reshape((1,)).astype(jnp.float32)

    total = n
    if total < pallas_min_elems:
        # pallas_call fixed cost dwarfs a handful of FMAs; let XLA fuse it.
        return (x.astype(jnp.float32) * w[0] + b[0]).astype(x.dtype)

    # Lane-dense slab: view the flat buffer as [rows, lanes] with lanes a
    # large multiple of 128 so stores are full unmasked vst.  Pad only to the
    # next multiple of `lanes` (zero-copy when already aligned); the ragged
    # final row-block of the grid is handled by Pallas' OOB write masking.
    rows = _cdiv(total, lanes)
    pad = rows * lanes - total

    x_flat = x.reshape(-1)                      # free (contiguous bitcast)
    if pad:
        x_flat = jnp.pad(x_flat, (0, pad))      # <= lanes-1 extra elements
    x_slab = x_flat.reshape(rows, lanes)

    if rows <= block_rows:
        blk_rows = rows                         # single block == full dim
        grid_n = 1
    else:
        blk_rows = block_rows                   # multiple of 8 (asserted)
        grid_n = _cdiv(rows, blk_rows)          # last block masked by Pallas

    out = pl.pallas_call(
        _fma_kernel,
        out_shape=jax.ShapeDtypeStruct((rows, lanes), x.dtype),
        grid=(grid_n,),
        in_specs=[
            pl.BlockSpec(memory_space=pltpu.SMEM),              # weight scalar
            pl.BlockSpec(memory_space=pltpu.SMEM),              # bias scalar
            pl.BlockSpec((blk_rows, lanes), lambda i: (i, 0)),  # x tile
        ],
        out_specs=pl.BlockSpec((blk_rows, lanes), lambda i: (i, 0)),
        compiler_params=pltpu.CompilerParams(
            dimension_semantics=("parallel",),
        ),
    )(w, b, x_slab)

    # Drop the padded tail (if any) and restore the [N, 1] PyTorch layout.
    if pad:
        return out.reshape(-1)[:total].reshape(n, 1)
    return out.reshape(n, 1)


if __name__ == "__main__":
    key = jax.random.PRNGKey(0)
    kx, kw, kb = jax.random.split(key, 3)

    # Batch of scalar features (Linear(1, 1)). N is deliberately not a
    # multiple of the 512-lane slab to exercise the pad + ragged-grid path.
    N = 4133
    x = jax.random.normal(kx, (N, 1), dtype=jnp.float32)

    # PyTorch-default-style init: U(-1/sqrt(fan_in), 1/sqrt(fan_in)), fan_in=1.
    weight = jax.random.uniform(kw, (1, 1), dtype=jnp.float32, minval=-1.0, maxval=1.0)
    bias = jax.random.uniform(kb, (1,), dtype=jnp.float32, minval=-1.0, maxval=1.0)

    y_ref = x @ weight.T + bias

    # 1) Default (perf-tuned) tiling — single block, minimal pad.
    y = linear_forward(x, weight, bias)
    jax.block_until_ready(y)
    assert y.shape == y_ref.shape
    assert jnp.allclose(y, y_ref, atol=1e-6), "mismatch vs reference (default tiling)"

    # 2) Small tiles to exercise the multi-step pipelined grid with a ragged
    #    (masked) final row-block.
    y_small = linear_forward(x, weight, bias, block_rows=8, lanes=128)
    jax.block_until_ready(y_small)
    assert jnp.allclose(y_small, y_ref, atol=1e-6), "mismatch vs reference (tiled grid)"

    # 3) Lane-aligned N: zero-copy reshape path (no pad, no output slice).
    x_al = jax.random.normal(kx, (2048, 1), dtype=jnp.float32)
    y_al = linear_forward(x_al, weight, bias)
    jax.block_until_ready(y_al)
    assert jnp.allclose(y_al, x_al @ weight.T + bias, atol=1e-6), \
        "mismatch vs reference (aligned N)"

    # 4) Tiny-batch fallback path (plain XLA fusion, no Pallas).
    y_tiny = linear_forward(x[:8], weight, bias)
    jax.block_until_ready(y_tiny)
    assert jnp.allclose(y_tiny, y_ref[:8], atol=1e-6), "mismatch vs reference (tiny N)"

    print("KERNEL_OK")
</pallas_src>

<mosaic_0001>
module attributes {stable_mosaic.version = 11 : i64} {
  func.func @_fma_kernel(%arg0: i32, %arg1: memref<1xf32, #tpu.memory_space<smem>>, %arg2: memref<1xf32, #tpu.memory_space<smem>>, %arg3: memref<9x512xf32, #tpu.memory_space<vmem>>, %arg4: memref<9x512xf32, #tpu.memory_space<vmem>>) attributes {dimension_semantics = [#tpu.dimension_semantics<parallel>], iteration_bounds = array<i64: 1>, scalar_prefetch = 0 : i64, scratch_operands = 0 : i64, tpu.core_type = #tpu.core_type<tc>, window_params = [{transform_indices = @transform_0, window_bounds = array<i64: 1>}, {transform_indices = @transform_1, window_bounds = array<i64: 1>}, {transform_indices = @transform_2, window_bounds = array<i64: 9, 512>}, {transform_indices = @transform_3, window_bounds = array<i64: 9, 512>}]} {
    %c0 = arith.constant 0 : index
    %0 = memref.load %arg1[%c0] : memref<1xf32, #tpu.memory_space<smem>>
    %c0_0 = arith.constant 0 : index
    %1 = memref.load %arg2[%c0_0] : memref<1xf32, #tpu.memory_space<smem>>
    %c0_1 = arith.constant 0 : index
    %c0_2 = arith.constant 0 : index
    %2 = vector.load %arg3[%c0_1, %c0_2] : memref<9x512xf32, #tpu.memory_space<vmem>>, vector<9x512xf32>
    %3 = vector.broadcast %0 : f32 to vector<9x512xf32>
    %4 = arith.mulf %2, %3 : vector<9x512xf32>
    %5 = vector.broadcast %1 : f32 to vector<9x512xf32>
    %6 = arith.addf %4, %5 : vector<9x512xf32>
    %c0_3 = arith.constant 0 : index
    %c0_4 = arith.constant 0 : index
    %7 = vector.load %arg4[%c0_3, %c0_4] : memref<9x512xf32, #tpu.memory_space<vmem>>, vector<9x512xf32>
    tpu.vector_store %arg4[%c0_3, %c0_4], %6 {strides = array<i32>} : memref<9x512xf32, #tpu.memory_space<vmem>>, vector<9x512xf32>,
    return
  }
  func.func @transform_0(%arg0: i32) -> i32 {
    %c0_i32 = arith.constant 0 : i32
    %c0_i32_0 = arith.constant 0 : i32
    return %c0_i32 : i32
  }
  func.func @transform_1(%arg0: i32) -> i32 {
    %c0_i32 = arith.constant 0 : i32
    %c0_i32_0 = arith.constant 0 : i32
    return %c0_i32 : i32
  }
  func.func @transform_2(%arg0: i32) -> (i32, i32) {
    %c0_i32 = arith.constant 0 : i32
    %c0_i32_0 = arith.constant 0 : i32
    return %arg0, %c0_i32 : i32, i32
  }
  func.func @transform_3(%arg0: i32) -> (i32, i32) {
    %c0_i32 = arith.constant 0 : i32
    %c0_i32_0 = arith.constant 0 : i32
    return %arg0, %c0_i32 : i32, i32
  }
}

</mosaic_0001>

<bundles_post_ra>
// kernel: tpu_custom_call.1
= control target key start
LH: loop header
LB: loop body
LE: loop exit
PB: predicated region body
PF: predicated region fallthrough
CT: control target
= control target key end

     0   :  { %10 = vsyncpa [#allocation5], 0  ;;  %s196_s0 = inlined_call_operand.<no memory space> [shape: f32[1], index: 0, kind: input, shape index: {}]   ;;  %s197_s1 = inlined_call_operand.<no memory space> [shape: f32[1], index: 1, kind: input, shape index: {}]   ;;  %s198_s2 = inlined_call_operand.hbm [shape: f32[9,512], index: 2, kind: input, shape index: {}]   ;;  %s199_s3 = inlined_call_operand.hbm [shape: f32[9,512], index: 3, kind: output, shape index: {}]  }
   0x1   :  { %11 = vsyncpa [#allocation6], 0  ;;  %s136_s12 = smov [#allocation4]   ;;  %s88_s16 = scalar_lea.hbm %s198_s2, 1024 }
   0x2   :  { %s21_s13 = sshll.u32 %s136_s12, 4  ;;  %p89_p0 = scmp.ne.s32.totalorder %s198_s2, %s88_s16  ;;  %s22_s13 = int_to_ptr.vmem [resolvable:$true] %s21_s13 }
   0x3   :  { %p92_p1 = scmp.lt.u32.totalorder %s88_s16, %s198_s2 }
   0x5   :  { %p94_p2 = pnand %p92_p1, %p89_p0 }
   0x7   :  { %97 = shalt.err (!%p94_p2)
}
   0x8   :  { %s98_s21 = scalar_lea.vmem %s22_s13, 1024  ;;  %p103_p4 = scmp.lt.s32.totalorder %s22_s13, %s22_s13 }
   0x9   :  { %p99_p3 = scmp.ne.s32.totalorder %s22_s13, %s98_s21  ;;  %p104_p5 = scmp.lt.s32.totalorder %s98_s21, %s98_s21 }
   0xb   :  { %p105_p6 = por %p104_p5, %p103_p4 }
   0xd   :  { %p106_p7 = pnand %p105_p6, %p99_p3 }
   0xf   :  { %109 = shalt.err (!%p106_p7)
}
  0x10   :  { %s137_s22 = smov 512   ;;  %s138_s23 = smov 32  }
  0x11   :  { %27 = dma.hbm_to_vmem [thread:$0]  %s198_s2, 1024, %s22_s13, [#allocation5], %s137_s22, %s137_s22, %s138_s23  }
  0x12   :  { %132 = dma.done.wait [#allocation5], 1024  }
  0x13   :  { %133 = vsyncadd [#allocation5], 4294966272  ;;  %v41_v0 = vstv %s196_s0  ;;  %v33_v1 = vld [vmem:[#allocation4] sm:$0xff]  ;;  %v50_v2 = vstv %s197_s1  ;;  %v34_v3 = vld [vmem:[#allocation4 + $0x8] sm:$0xff]  ;;  %s139_s0 = smov [#allocation7]  }
  0x14   :  { %v35_v4 = vld [vmem:[#allocation4 + $0x10] sm:$0xff]  ;;  %v42_v5 = vmul.f32 %v41_v0, %v33_v1  ;;  %v43_v6 = vmul.f32 %v41_v0, %v34_v3  ;;  %v36_v8 = vld [vmem:[#allocation4 + $0x18] sm:$0xff]  ;;  %v37_v9 = vld [vmem:[#allocation4 + $0x20] sm:$0x1]  ;;  %s72_s2 = sshll.u32 %s139_s0, 4  ;;  %s73_s2 = int_to_ptr.vmem [resolvable:$true] %s72_s2 }
  0x15   :  { %v44_v7 = vmul.f32 %v41_v0, %v35_v4  ;;  %v38_v10 = vld [vmem:[#allocation4 + $0x28] sm:$0x1]  ;;  %v45_v11 = vmul.f32 %v41_v0, %v36_v8  ;;  %v46_v12 = vmul.f32 %v41_v0, %v37_v9  ;;  %v39_v14 = vld [vmem:[#allocation4 + $0x30] sm:$0x1]  ;;  %v40_v15 = vld [vmem:[#allocation4 + $0x38] sm:$0x1]  ;;  %p115_p9 = scmp.lt.s32.totalorder %s73_s2, %s73_s2 }
  0x16   :  { %v47_v13 = vmul.f32 %v41_v0, %v38_v10  ;;  %v51_v16 = vadd.f32 %v50_v2, %v42_v5  ;;  %v52_v17 = vadd.f32 %v50_v2, %v43_v6  ;;  %v48_v19 = vmul.f32 %v41_v0, %v39_v14  ;;  %s110_s1 = scalar_lea.vmem %s73_s2, 1024 }
  0x17   :  { %v53_v18 = vadd.f32 %v50_v2, %v44_v7  ;;  %v54_v20 = vadd.f32 %v50_v2, %v45_v11  ;;  %v55_v21 = vadd.f32 %v50_v2, %v46_v12  ;;  %v49_v23 = vmul.f32 %v41_v0, %v40_v15  ;;  %p111_p8 = scmp.ne.s32.totalorder %s73_s2, %s110_s1  ;;  %p116_p10 = scmp.lt.s32.totalorder %s110_s1, %s110_s1 }
  0x18   :  { %v56_v22 = vadd.f32 %v50_v2, %v47_v13  ;;  %59 = vst [vmem:[#allocation7] sm:$0xff] %v51_v16  ;;  %60 = vst [vmem:[#allocation7 + $0x8] sm:$0xff] %v52_v17  ;;  %v57_v24 = vadd.f32 %v50_v2, %v48_v19 }
  0x19   :  { %61 = vst [vmem:[#allocation7 + $0x10] sm:$0xff] %v53_v18  ;;  %62 = vst [vmem:[#allocation7 + $0x18] sm:$0xff] %v54_v20  ;;  %v58_v25 = vadd.f32 %v50_v2, %v49_v23  ;;  %p117_p11 = por %p116_p10, %p115_p9 }
  0x1a   :  { %63 = vst [vmem:[#allocation7 + $0x20] sm:$0x1] %v55_v21  ;;  %64 = vst [vmem:[#allocation7 + $0x28] sm:$0x1] %v56_v22 }
  0x1b   :  { %65 = vst [vmem:[#allocation7 + $0x30] sm:$0x1] %v57_v24  ;;  %66 = vst [vmem:[#allocation7 + $0x38] sm:$0x1] %v58_v25  ;;  %p118_p12 = pnand %p117_p11, %p111_p8 }
  0x1d   :  { %121 = shalt.err (!%p118_p12)
}
  0x1e   :  { %s122_s5 = scalar_lea.hbm %s199_s3, 1024 }
  0x1f   :  { %p123_p13 = scmp.ne.s32.totalorder %s199_s3, %s122_s5  ;;  %p126_p0 = scmp.lt.u32.totalorder %s122_s5, %s199_s3 }
  0x21   :  { %p128_p1 = pnand %p126_p0, %p123_p13 }
  0x23   :  { %131 = shalt.err (!%p128_p1)
}
  0x24   :  { %78 = dma.vmem_to_hbm [thread:$0]  %s73_s2, 1024, %s199_s3, [#allocation6], %s137_s22, %s137_s22, %s138_s23  }
  0x25   :  { %134 = dma.done.wait [#allocation6], 1024  }
  0x26   :  { %135 = vsyncadd [#allocation6], 4294966272 }
  0x27   :  { %82 = vsyncpa [#allocation5], 1 }
  0x28   :  { %83 = vsyncpa [#allocation6], 1 }

</bundles_post_ra>
